<compile_context>
chip_gen: v5e
topology: v5e:2x2
jax: 0.10.0
libtpu: 0.0.40
codegen_flags: <defaults>
</compile_context>

<pallas_src>
import jax
import jax.numpy as jnp
from jax.experimental import pallas as pl
from jax.experimental.pallas import tpu as pltpu


_DEFAULT_VMEM_CAP = 64 << 20  # conservative fallback: v7x has the smallest VMEM


def _vmem_capacity_bytes():
    """Physical per-TensorCore VMEM; conservative (v7x-sized) fallback."""
    try:
        cap = int(pltpu.get_tpu_info().vmem_capacity_bytes)
        if cap > 0:
            return cap
    except Exception:  # not on TPU / API unavailable -> be conservative
        pass
    return _DEFAULT_VMEM_CAP


# ---------------------------------------------------------------------------
# Fused single-pass kernel: squeeze + excitation + scale with x resident.
# ---------------------------------------------------------------------------
def _se_fused_kernel(x_ref, w1_ref, b1_ref, w2_ref, b2_ref, o_ref):
    # x_ref : (1, C, HW)  -- spatial on lanes, channels on sublanes
    # w1_ref: (C, S)   b1_ref: (1, S)   w2_ref: (C, S)   b2_ref: (C, 1)
    x = x_ref[0]                                   # (C, HW), native dtype
    hw = x.shape[1]

    # Squeeze: mean over the spatial (lane) axis, accumulated in float32.
    pooled = jnp.sum(x.astype(jnp.float32), axis=1, keepdims=True) * (1.0 / hw)  # (C, 1)

    # Excitation: tiny per-image GEMVs as broadcast-multiply + reduce (kept off
    # the MXU on purpose -- see module docstring; this work hides under DMA).
    h = jnp.sum(w1_ref[...] * pooled, axis=0, keepdims=True) + b1_ref[...]   # (1, S)
    h = h * jax.nn.sigmoid(h)                                                # swish
    s = jnp.sum(w2_ref[...] * h, axis=1, keepdims=True) + b2_ref[...]        # (C, 1)
    s = jax.nn.sigmoid(s)

    # Scale: per-channel gate broadcast along lanes.  Multiply in the input's
    # native dtype (bf16 stays bf16) so no full-block f32 temporary is created
    # on the store side.  (On v5e the compiler legalizes bf16 VALU ops.)
    o_ref[0] = (x * s.astype(x.dtype)).astype(o_ref.dtype)


def _weight_spec(shape):
    # Grid-invariant weights (constant index_map): single-buffer them so the
    # freed VMEM goes to the per-image x blocks instead.
    return pl.BlockSpec(shape, lambda n: (0,) * len(shape),
                        pipeline_mode=pl.Buffered(1))


def _se_fused(x_ncl, w1_cs, b1_1s, w2_cs, b2_c1, *, vmem_budget_bytes):
    N, C, HW = x_ncl.shape
    S = w1_cs.shape[1]
    itemsize = x_ncl.dtype.itemsize

    block_bytes = C * HW * itemsize
    weight_bytes = int((w1_cs.size + b1_1s.size + w2_cs.size + b2_c1.size) * 4)

    # VMEM need: x/out double-buffered (4 blocks) + one native-dtype product
    # temporary + worst-case f32 staging for the pooled reduction (in case the
    # compiler materializes the astype) + single-buffered weights + margin.
    conv_temp_bytes = block_bytes * (4 // itemsize)
    vmem_need = 5 * block_bytes + conv_temp_bytes + weight_bytes + (2 << 20)
    vmem_limit = int(min(max(vmem_need, 8 << 20), vmem_budget_bytes))

    cost = pl.CostEstimate(
        flops=int(N * (2 * HW * C + 4 * C * S)),
        transcendentals=int(N * (S + C)),
        bytes_accessed=int(2 * N * HW * C * itemsize + weight_bytes),
    )

    return pl.pallas_call(
        _se_fused_kernel,
        out_shape=jax.ShapeDtypeStruct((N, C, HW), x_ncl.dtype),
        grid_spec=pltpu.PrefetchScalarGridSpec(
            num_scalar_prefetch=0,
            grid=(N,),
            in_specs=[
                pl.BlockSpec((1, C, HW), lambda n: (n, 0, 0)),
                _weight_spec((C, S)),
                _weight_spec((1, S)),
                _weight_spec((C, S)),
                _weight_spec((C, 1)),
            ],
            out_specs=pl.BlockSpec((1, C, HW), lambda n: (n, 0, 0)),
        ),
        compiler_params=pltpu.CompilerParams(
            dimension_semantics=("parallel",),
            vmem_limit_bytes=vmem_limit,
        ),
        cost_estimate=cost,
    )(x_ncl, w1_cs, b1_1s, w2_cs, b2_c1)


# ---------------------------------------------------------------------------
# Tiled path for large feature maps: XLA squeeze/excitation + Pallas scale.
# ---------------------------------------------------------------------------
def _se_scale_kernel(x_ref, g_ref, o_ref):
    # x_ref: (1, Ct, Lt)   g_ref: (1, Ct, 1)   o_ref: (1, Ct, Lt)
    o_ref[...] = (x_ref[...] * g_ref[...]).astype(o_ref.dtype)


def _se_tiled(x_ncl, w1_cs, b1_1s, w2_cs, b2_c1, *, vmem_budget_bytes,
              tile_target_bytes=None, x_buffers=None):
    N, C, HW = x_ncl.shape
    itemsize = x_ncl.dtype.itemsize

    # Squeeze + excitation on the tiny (N, C)/(N, S) tensors in plain XLA; the
    # HBM roofline here is the streaming read/scale/write of x, not the GEMVs.
    pooled = jnp.mean(x_ncl.astype(jnp.float32), axis=-1)           # (N, C)
    h = pooled @ w1_cs + b1_1s                                      # (N, S)
    h = h * jax.nn.sigmoid(h)
    gate = jax.nn.sigmoid(h @ w2_cs.T + b2_c1.T)                    # (N, C), f32
    if itemsize < 4:                       # keep bf16 compute in bf16
        gate = gate.astype(x_ncl.dtype)
    gate = gate[:, :, None]                                         # (N, C, 1)

    if tile_target_bytes is None:
        # ~0.35 us/grid-step overhead -> multi-MiB blocks; keep ~6-8 blocks
        # (4 double-buffered x/out + product temp + slack) inside the budget.
        tile_target_bytes = int(min(8 << 20, max(1 << 20, vmem_budget_bytes // 8)))

    # Prefer channel (sublane) tiles with the FULL spatial extent: each block
    # row is a contiguous HW*itemsize strip in HBM (near-ideal DMA bursts).
    # Only when even `sub` full rows exceed the tile budget do we also tile the
    # lane axis (strided-DMA fallback for enormous feature maps).
    sub = 8 if itemsize >= 4 else 32 // itemsize       # f32: 8, bf16: 16
    row_bytes = HW * itemsize
    if sub * row_bytes <= tile_target_bytes:
        c_tile = min(C, max(sub, (tile_target_bytes // row_bytes) // sub * sub))
        lane_tile = HW
    else:
        c_tile = min(C, sub)
        lane_tile = min(HW, max(128, (tile_target_bytes // (c_tile * itemsize))
                                // 128 * 128))

    grid = (N, pl.cdiv(C, c_tile), pl.cdiv(HW, lane_tile))

    block_bytes = c_tile * lane_tile * itemsize
    vmem_need = 5 * block_bytes + 4 * c_tile * 4 + (2 << 20)
    vmem_limit = int(min(max(vmem_need, 8 << 20), vmem_budget_bytes))

    cost = pl.CostEstimate(
        flops=int(N * HW * C),
        transcendentals=0,
        bytes_accessed=int(2 * N * HW * C * itemsize + N * C * 4),
    )

    x_kwargs = {}
    if x_buffers is not None:   # sweepable: deeper buffering if DMA is exposed
        x_kwargs["pipeline_mode"] = pl.Buffered(int(x_buffers))

    return pl.pallas_call(
        _se_scale_kernel,
        out_shape=jax.ShapeDtypeStruct((N, C, HW), x_ncl.dtype),
        grid_spec=pltpu.PrefetchScalarGridSpec(
            num_scalar_prefetch=0,
            grid=grid,
            in_specs=[
                pl.BlockSpec((1, c_tile, lane_tile), lambda n, c, l: (n, c, l),
                             **x_kwargs),
                pl.BlockSpec((1, c_tile, 1), lambda n, c, l: (n, c, 0)),
            ],
            out_specs=pl.BlockSpec((1, c_tile, lane_tile),
                                   lambda n, c, l: (n, c, l)),
        ),
        compiler_params=pltpu.CompilerParams(
            dimension_semantics=("parallel", "parallel", "parallel"),
            vmem_limit_bytes=vmem_limit,
        ),
        cost_estimate=cost,
    )(x_ncl, gate)


# ---------------------------------------------------------------------------
# Public wrapper (PyTorch weight layouts).
# ---------------------------------------------------------------------------
def se_forward(x_nchw, w1, b1, w2, b2, *, force_tiled=False,
               fused_block_limit_bytes=None, tile_target_bytes=None,
               x_buffers=None):
    """SE forward pass.

    Args:
      x_nchw: (N, C, H, W) input, as in the PyTorch module.
      w1: (S, C)  == se1.weight[:, :, 0, 0]
      b1: (S,)    == se1.bias
      w2: (C, S)  == se2.weight[:, :, 0, 0]
      b2: (C,)    == se2.bias
    """
    N, C, H, W = x_nchw.shape
    S = w1.shape[0]
    HW = H * W
    itemsize = x_nchw.dtype.itemsize

    # Pure reshape (no transpose): spatial -> lanes, channels -> sublanes.
    x_ncl = x_nchw.reshape(N, C, HW)

    w1_cs = jnp.asarray(w1, jnp.float32).T.reshape(C, S)
    b1_1s = jnp.asarray(b1, jnp.float32).reshape(1, S)
    w2_cs = jnp.asarray(w2, jnp.float32).reshape(C, S)
    b2_c1 = jnp.asarray(b2, jnp.float32).reshape(C, 1)

    # Generation-aware VMEM policy: budget ~80% of physical per-core VMEM
    # (v5e/v6e ~102 MiB, v7x ~51 MiB) and derive the fused/tiled crossover
    # from it.  Fused path = 2x HBM traffic of x; tiled path = 3x (extra full
    # read for the XLA pooling), so every shape kept fused is ~33% faster.
    vmem_budget = int(0.8 * _vmem_capacity_bytes())
    weight_bytes = 4 * (2 * C * S + S + C)              # f32, single-buffered
    if fused_block_limit_bytes is None:
        # Per-image block budget: 2 in + 2 out buffers + 1 product temp +
        # worst-case f32 staging for the pooled reduction (4/itemsize blocks).
        denom = 5 + 4 // itemsize
        fused_block_limit_bytes = max(0, vmem_budget - weight_bytes - (2 << 20)) // denom

    per_image_bytes = C * HW * itemsize
    # TODO(synk): on v7x, N == 1 leaves one TensorCore idle on the fused path;
    # measure single-core DMA bandwidth before adding an HW-split grid axis.
    if not force_tiled and per_image_bytes <= fused_block_limit_bytes:
        out = _se_fused(x_ncl, w1_cs, b1_1s, w2_cs, b2_c1,
                        vmem_budget_bytes=vmem_budget)
    else:
        out = _se_tiled(x_ncl, w1_cs, b1_1s, w2_cs, b2_c1,
                        vmem_budget_bytes=vmem_budget,
                        tile_target_bytes=tile_target_bytes,
                        x_buffers=x_buffers)
    return out.reshape(N, C, H, W)


def se_reference(x_nchw, w1, b1, w2, b2):
    """Plain-JAX reference mirroring the PyTorch forward (f32 math)."""
    x = x_nchw.astype(jnp.float32)
    pooled = jnp.mean(x, axis=(2, 3))                                    # (N, C)
    h = pooled @ jnp.asarray(w1, jnp.float32).T + jnp.asarray(b1, jnp.float32)
    h = h * jax.nn.sigmoid(h)
    s = jax.nn.sigmoid(h @ jnp.asarray(w2, jnp.float32).T
                       + jnp.asarray(b2, jnp.float32))                   # (N, C)
    return x * s[:, :, None, None]


if __name__ == "__main__":
    key = jax.random.PRNGKey(0)
    N, C, H, W = 2, 4, 16, 16
    S = 8  # se_channels

    k_x, k_w1, k_b1, k_w2, k_b2, k_big = jax.random.split(key, 6)
    x = jax.random.normal(k_x, (N, C, H, W), dtype=jnp.float32)

    # Deterministic "Conv2d 1x1" params in PyTorch layout:
    # se1.weight (S, C, 1, 1) -> (S, C); se2.weight (C, S, 1, 1) -> (C, S).
    w1 = 0.1 * jax.random.normal(k_w1, (S, C), dtype=jnp.float32)
    b1 = 0.1 * jax.random.normal(k_b1, (S,), dtype=jnp.float32)
    w2 = 0.1 * jax.random.normal(k_w2, (C, S), dtype=jnp.float32)
    b2 = 0.1 * jax.random.normal(k_b2, (C,), dtype=jnp.float32)

    ref = se_reference(x, w1, b1, w2, b2)

    # 1) Fused single-pass kernel (the path typical SE shapes now take).
    out = jax.block_until_ready(se_forward(x, w1, b1, w2, b2))
    assert out.shape == (N, C, H, W)
    assert jnp.allclose(out, ref, atol=1e-5, rtol=1e-5), "fused kernel mismatch"

    # 2) Tiled path with contiguous channel tiles (c_tile == C, lane_tile == HW).
    out_t = jax.block_until_ready(se_forward(x, w1, b1, w2, b2, force_tiled=True))
    assert jnp.allclose(out_t, ref, atol=1e-5, rtol=1e-5), "tiled kernel mismatch"

    # 3) Tiled path, lane-split fallback (tiny tile budget forces HW tiling).
    out_l = jax.block_until_ready(
        se_forward(x, w1, b1, w2, b2, force_tiled=True, tile_target_bytes=2 << 10))
    assert jnp.allclose(out_l, ref, atol=1e-5, rtol=1e-5), "lane-tiled kernel mismatch"

    # 4) bf16 input exercises the native-dtype gating path (fused + tiled).
    Cb, Sb, Hb, Wb = 64, 16, 32, 32
    kb = jax.random.split(k_big, 5)
    xb = jax.random.normal(kb[0], (N, Cb, Hb, Wb), dtype=jnp.float32).astype(jnp.bfloat16)
    w1b = 0.1 * jax.random.normal(kb[1], (Sb, Cb), dtype=jnp.float32)
    b1b = 0.1 * jax.random.normal(kb[2], (Sb,), dtype=jnp.float32)
    w2b = 0.1 * jax.random.normal(kb[3], (Cb, Sb), dtype=jnp.float32)
    b2b = 0.1 * jax.random.normal(kb[4], (Cb,), dtype=jnp.float32)
    refb = se_reference(xb, w1b, b1b, w2b, b2b)
    outb = jax.block_until_ready(se_forward(xb, w1b, b1b, w2b, b2b))
    assert jnp.allclose(outb.astype(jnp.float32), refb, atol=2e-2, rtol=2e-2), \
        "bf16 fused kernel mismatch"
    outb_t = jax.block_until_ready(
        se_forward(xb, w1b, b1b, w2b, b2b, force_tiled=True))
    assert jnp.allclose(outb_t.astype(jnp.float32), refb, atol=2e-2, rtol=2e-2), \
        "bf16 tiled kernel mismatch"

    print("KERNEL_OK")
</pallas_src>

<mosaic_0001>
module attributes {stable_mosaic.version = 11 : i64} {
  func.func @_se_fused_kernel(%arg0: i32, %arg1: memref<1x4x256xf32, #tpu.memory_space<vmem>>, %arg2: memref<4x8xf32, #tpu.memory_space<vmem>>, %arg3: memref<1x8xf32, #tpu.memory_space<vmem>>, %arg4: memref<4x8xf32, #tpu.memory_space<vmem>>, %arg5: memref<4x1xf32, #tpu.memory_space<vmem>>, %arg6: memref<1x4x256xf32, #tpu.memory_space<vmem>>) attributes {dimension_semantics = [#tpu.dimension_semantics<parallel>], iteration_bounds = array<i64: 2>, scalar_prefetch = 0 : i64, scratch_operands = 0 : i64, tpu.core_type = #tpu.core_type<tc>, window_params = [{transform_indices = @transform_0, window_bounds = array<i64: 1, 4, 256>}, {pipeline_mode = #tpu.pipeline_mode<synchronous>, transform_indices = @transform_1, window_bounds = array<i64: 4, 8>}, {pipeline_mode = #tpu.pipeline_mode<synchronous>, transform_indices = @transform_2, window_bounds = array<i64: 1, 8>}, {pipeline_mode = #tpu.pipeline_mode<synchronous>, transform_indices = @transform_3, window_bounds = array<i64: 4, 8>}, {pipeline_mode = #tpu.pipeline_mode<synchronous>, transform_indices = @transform_4, window_bounds = array<i64: 4, 1>}, {transform_indices = @transform_5, window_bounds = array<i64: 1, 4, 256>}]} {
    %c0 = arith.constant 0 : index
    %c0_0 = arith.constant 0 : index
    %c0_1 = arith.constant 0 : index
    %0 = vector.load %arg1[%c0, %c0_0, %c0_1] : memref<1x4x256xf32, #tpu.memory_space<vmem>>, vector<1x4x256xf32>
    %1 = vector.shape_cast %0 : vector<1x4x256xf32> to vector<4x256xf32>
    %cst = arith.constant dense<0.000000e+00> : vector<4xf32>
    %2 = vector.multi_reduction <add>, %1, %cst [1] : vector<4x256xf32> to vector<4xf32>
    %3 = vector.shape_cast %2 : vector<4xf32> to vector<4x1xf32>
    %cst_2 = arith.constant 3.906250e-03 : f32
    %4 = vector.broadcast %cst_2 : f32 to vector<4x1xf32>
    %5 = arith.mulf %3, %4 : vector<4x1xf32>
    %c0_3 = arith.constant 0 : index
    %c0_4 = arith.constant 0 : index
    %6 = vector.load %arg2[%c0_3, %c0_4] : memref<4x8xf32, #tpu.memory_space<vmem>>, vector<4x8xf32>
    %7 = vector.broadcast %5 : vector<4x1xf32> to vector<4x8xf32>
    %8 = arith.mulf %6, %7 : vector<4x8xf32>
    %cst_5 = arith.constant dense<0.000000e+00> : vector<8xf32>
    %9 = vector.multi_reduction <add>, %8, %cst_5 [0] : vector<4x8xf32> to vector<8xf32>
    %10 = vector.shape_cast %9 : vector<8xf32> to vector<1x8xf32>
    %c0_6 = arith.constant 0 : index
    %c0_7 = arith.constant 0 : index
    %11 = vector.load %arg3[%c0_6, %c0_7] : memref<1x8xf32, #tpu.memory_space<vmem>>, vector<1x8xf32>
    %12 = arith.addf %10, %11 : vector<1x8xf32>
    %13 = arith.negf %12 : vector<1x8xf32>
    %14 = math.exp %13 : vector<1x8xf32>
    %cst_8 = arith.constant 1.000000e+00 : f32
    %15 = vector.broadcast %cst_8 : f32 to vector<1x8xf32>
    %16 = arith.addf %15, %14 : vector<1x8xf32>
    %17 = arith.divf %15, %16 : vector<1x8xf32>
    %18 = arith.mulf %12, %17 : vector<1x8xf32>
    %c0_9 = arith.constant 0 : index
    %c0_10 = arith.constant 0 : index
    %19 = vector.load %arg4[%c0_9, %c0_10] : memref<4x8xf32, #tpu.memory_space<vmem>>, vector<4x8xf32>
    %20 = vector.broadcast %18 : vector<1x8xf32> to vector<4x8xf32>
    %21 = arith.mulf %19, %20 : vector<4x8xf32>
    %cst_11 = arith.constant dense<0.000000e+00> : vector<4xf32>
    %22 = vector.multi_reduction <add>, %21, %cst_11 [1] : vector<4x8xf32> to vector<4xf32>
    %23 = vector.shape_cast %22 : vector<4xf32> to vector<4x1xf32>
    %c0_12 = arith.constant 0 : index
    %c0_13 = arith.constant 0 : index
    %24 = vector.load %arg5[%c0_12, %c0_13] : memref<4x1xf32, #tpu.memory_space<vmem>>, vector<4x1xf32>
    %25 = arith.addf %23, %24 : vector<4x1xf32>
    %26 = arith.negf %25 : vector<4x1xf32>
    %27 = math.exp %26 : vector<4x1xf32>
    %cst_14 = arith.constant 1.000000e+00 : f32
    %28 = vector.broadcast %cst_14 : f32 to vector<4x1xf32>
    %29 = arith.addf %28, %27 : vector<4x1xf32>
    %30 = arith.divf %28, %29 : vector<4x1xf32>
    %31 = vector.broadcast %30 : vector<4x1xf32> to vector<4x256xf32>
    %32 = arith.mulf %1, %31 : vector<4x256xf32>
    %c0_15 = arith.constant 0 : index
    %c0_16 = arith.constant 0 : index
    %c0_17 = arith.constant 0 : index
    %33 = vector.load %arg6[%c0_15, %c0_16, %c0_17] : memref<1x4x256xf32, #tpu.memory_space<vmem>>, vector<1x4x256xf32>
    %34 = vector.shape_cast %33 : vector<1x4x256xf32> to vector<4x256xf32>
    %35 = vector.shape_cast %32 : vector<4x256xf32> to vector<1x4x256xf32>
    tpu.vector_store %arg6[%c0_15, %c0_16, %c0_17], %35 {strides = array<i32>} : memref<1x4x256xf32, #tpu.memory_space<vmem>>, vector<1x4x256xf32>,
    return
  }
  func.func @transform_0(%arg0: i32) -> (i32, i32, i32) {
    %c0_i32 = arith.constant 0 : i32
    %c0_i32_0 = arith.constant 0 : i32
    %c0_i32_1 = arith.constant 0 : i32
    return %arg0, %c0_i32, %c0_i32_0 : i32, i32, i32
  }
  func.func @transform_1(%arg0: i32) -> (i32, i32) {
    %c0_i32 = arith.constant 0 : i32
    %c0_i32_0 = arith.constant 0 : i32
    %c0_i32_1 = arith.constant 0 : i32
    return %c0_i32, %c0_i32_0 : i32, i32
  }
  func.func @transform_2(%arg0: i32) -> (i32, i32) {
    %c0_i32 = arith.constant 0 : i32
    %c0_i32_0 = arith.constant 0 : i32
    %c0_i32_1 = arith.constant 0 : i32
    return %c0_i32, %c0_i32_0 : i32, i32
  }
  func.func @transform_3(%arg0: i32) -> (i32, i32) {
    %c0_i32 = arith.constant 0 : i32
    %c0_i32_0 = arith.constant 0 : i32
    %c0_i32_1 = arith.constant 0 : i32
    return %c0_i32, %c0_i32_0 : i32, i32
  }
  func.func @transform_4(%arg0: i32) -> (i32, i32) {
    %c0_i32 = arith.constant 0 : i32
    %c0_i32_0 = arith.constant 0 : i32
    %c0_i32_1 = arith.constant 0 : i32
    return %c0_i32, %c0_i32_0 : i32, i32
  }
  func.func @transform_5(%arg0: i32) -> (i32, i32, i32) {
    %c0_i32 = arith.constant 0 : i32
    %c0_i32_0 = arith.constant 0 : i32
    %c0_i32_1 = arith.constant 0 : i32
    return %arg0, %c0_i32, %c0_i32_0 : i32, i32, i32
  }
}

</mosaic_0001>

<bundles_post_ra>
// kernel: tpu_custom_call.1
= control target key start
LH: loop header
LB: loop body
LE: loop exit
PB: predicated region body
PF: predicated region fallthrough
CT: control target
= control target key end

     0   :  { %10 = vsyncpa [#allocation3], 0  ;;  %s850_s0 = inlined_call_operand.hbm [shape: f32[2,4,256], index: 0, kind: input, shape index: {}]   ;;  %s851_s1 = inlined_call_operand.vmem [shape: f32[4,8], index: 1, kind: input, shape index: {}]   ;;  %s852_s2 = inlined_call_operand.vmem [shape: f32[1,8], index: 2, kind: input, shape index: {}]   ;;  %s853_s3 = inlined_call_operand.hbm [shape: f32[4,8], index: 3, kind: input, shape index: {}]   ;;  %s854_s4 = inlined_call_operand.vmem [shape: f32[4,1], index: 4, kind: input, shape index: {}]   ;;  %s855_s5 = inlined_call_operand.hbm [shape: f32[2,4,256], index: 5, kind: output, shape index: {}]  }
   0x1   :  { %12 = vsyncpa [#allocation3 + $0x1], 0 }
   0x2   :  { %13 = vsyncpa [#allocation6], 0 }
   0x3   :  { %14 = vsyncpa [#allocation4], 0 }
   0x4   :  { %16 = vsyncpa [#allocation4 + $0x1], 0  ;;  %s693_s18 = smov 0   ;;  %s695_s19 = smov 0  }
   0x5   :  { %s697_s20 = smov 0   ;;  %s699_s21 = smov 0  }
   0x6 LB: > { %s714_s22 = sadd.s32 4294967295, %s658_s21   ;;  %s439_s23 = sadd.s32 4294967294, %s658_s21   ;;  %s658_s21 = sphi %s699_s21, %s865_s21   ;;  %s654_s20 = sphi %s697_s20, %s864_s20   ;;  %s650_s19 = sphi %s695_s19, %s863_s19   ;;  %s646_s18 = sphi %s693_s18, %s862_s18  }
   0x7   : > { %p42_p0 = scmp.ne.s32.totalorder %s650_s19, %s646_s18  ;;  %p43_p1 = scmp.eq.s32.totalorder %s714_s22, 0 }
   0x8   : > { %p150_p2 = scmp.eq.s32.totalorder %s714_s22, 1  ;;  %p156_p3 = scmp.eq.s32.totalorder %s439_s23, 1 }
   0x9   : > { %p723_p4 = por %p43_p1, %p42_p0  ;;  %p440_p5 = scmp.ge.s32.totalorder %s658_s21, 1 }
   0xa   : > { %p728_p6 = por %p156_p3, %p42_p0  ;;  %p163_p7 = scmp.lt.s32.totalorder %s658_s21, 3 }
   0xb   : > { %s181_s28 = sshll.u32 %s853_s3, 4  ;;  %s660_s30 = smov [#allocation5]   ;;  %s182_s28 = int_to_ptr.hbm [resolvable:$true] %s181_s28 }
   0xc   : > { %p736_p8 = pnand %p440_p5, %p163_p7  ;;  %s183_s6 = sshll.u32 %s660_s30, 4  ;;  %s184_s6 = int_to_ptr.vmem [resolvable:$true] %s183_s6 }
   0xd   : > { %s746_s7 = sadd.s32 1, %s658_s21   ;;  %s29_s8 = sadd.s32 1, %s654_s20 }
   0xe   : > { %p467_p10 = pneg %p736_p8  ;;  %s26_s9 = ssub.s32 %s658_s21, %s746_s7 }
   0xf   : > { %p27_p12 = scmp.eq.s32.totalorder %s26_s9, 0  ;;  %p36_p13 = scmp.ne.s32.totalorder %s654_s20, %s650_s19 }
  0x10   : > { %p468_p11 = pnand %p467_p10, %p43_p1  ;;  %p37_p0 = scmp.eq.s32.totalorder %s658_s21, 0 }
  0x11   : > { %s755_s10 = scalar_select %p27_p12, %s654_s20, %s29_s8  }
  0x12   : > { %470 = dma.hbm_to_vmem [thread:$0]  (!%p468_p11), %s182_s28, 64, %s184_s6, [#allocation6]  }
  0x13   : > { %p759_p3 = por %p150_p2, %p36_p13  ;;  %p480_p5 = scmp.lt.s32.totalorder %s658_s21, 2 }
  0x14   : > { %s197_s12 = sand.u32 1, %s654_s20   ;;  %s457_s13 = sshll.u32 %s658_s21, 3 }
  0x15   : > { %p38_p7 = por %p37_p0, %p36_p13  ;;  %s443_s14 = sshll.u32 %s197_s12, 3 }
  0x16   : > { %s206_s17 = scalar_lea.hbm %s850_s0, %s457_s13  ;;  %s201_s26 = scalar_lea.vmem [#allocation2], %s443_s14 }
  0x17   : > { %s208_s23 = sshll.u32 %s206_s17, 4  ;;  %s210_s27 = sshll.u32 %s201_s26, 4  ;;  %s209_s23 = int_to_ptr.hbm [resolvable:$true] %s208_s23  ;;  %s211_s27 = int_to_ptr.vmem [resolvable:$true] %s210_s27 }
  0x18   : > { %p769_p10 = pnand %p480_p5, %p38_p7  ;;  %s198_s30 = scalar_lea.sflag [#allocation3], %s197_s12 }
  0x19   : > { %s558_s6 = sshra.s32 %s209_s23, 4  ;;  %s565_s14 = scalar_lea.hbm %s850_s0, 16  ;;  %s559_s6 = int_to_ptr.hbm [resolvable:$true] %s558_s6 }
  0x1a   : > { %s560_s8 = scalar_lea.hbm %s559_s6, 8  ;;  %p562_p11 = pneg %p769_p10 }
  0x1b   : > { %p561_p2 = scmp.ne.s32.totalorder %s559_s6, %s560_s8  ;;  %p566_p0 = scmp.lt.s32.totalorder %s559_s6, %s850_s0 }
  0x1c   : > { %p567_p5 = scmp.lt.s32.totalorder %s565_s14, %s560_s8 }
  0x1d   : > { %p563_p12 = pnand %p562_p11, %p561_p2 }
  0x1e   : > { %p568_p7 = por %p567_p5, %p566_p0 }
  0x1f   : > { %p564_p13 = pneg %p563_p12 }
  0x21   : > { %p569_p9 = pnand %p568_p7, %p564_p13 }
  0x23   : > { %572 = shalt.err (!%p569_p9)
}
  0x24   : > { %474 = dma.hbm_to_vmem [thread:$0]  (!%p769_p10), %s209_s23, 128, %s211_s27, %s198_s30  }
  0x25   : > { %219 = sbr.rel (%p736_p8) target bundleno = 495 (0x1ef), region = 40  ;;  %s786_s12 = sand.u32 (!%p736_p8), 1, %s650_s19  }
  0x26   : > { %s447_s17 = sshll.u32 (!%p736_p8), %s786_s12, 3  ;;  %s222_s26 = scalar_lea.sflag (!%p736_p8), [#allocation3], %s786_s12 }
  0x27   : > { %s225_s6 = scalar_lea.vmem (!%p736_p8), [#allocation2], %s447_s17 }
  0x2a   : > { %633 = dma.done.wait (%p723_p4), %s222_s26, 128  }
  0x2b   : > { %635 = vsyncadd (%p723_p4), %s222_s26, 4294967168 }
  0x2c   : > { %637 = dma.done.wait (%p43_p1), [#allocation6], 64  }
  0x2d   : > { %639 = vsyncadd (%p43_p1), [#allocation6], 4294967232  ;;  %v800_v0 = vld [vmem:[%s225_s6] sm:$0xff]  ;;  %vm265_vm0 = vcmask 1043456   ;;  %v272_v6 = vld [vmem:[%s851_s1] sm:$0xf] }
  0x2e   : > { %260 = vst [vmem:[#allocation1] ss:$2 sm:$0xff] %v800_v0  ;;  %vm274_vm1 = vcmask 60416   ;;  %v282_v16 = vld [vmem:[%s852_s2] sm:$0x1]  ;;  %v661_v37 = vmov 0  }
  0x2f   : > { %v304_v33 = vld [vmem:[#allocation5] sm:$0xf]  ;;  %518 = vset.pattern.permute.xlu1 %v661_v37  ;;  %519 = vset.pattern.permute.xlu0 %v661_v37  ;;  %v310_v38 = vld [vmem:[%s854_s4] sm:$0xf]  ;;  %v662_v54 = vmov 839922192  }
  0x30   : > { %v336_v55 = vunpack.c.l.s4 %v662_v54  ;;  %s458_s8 = sshll.u32 %s714_s22, 3  ;;  %s257_s15 = scalar_lea.vmem [#allocation7], %s447_s17 }
  0x31   : > { %s354_s14 = scalar_lea.hbm %s855_s5, %s458_s8  ;;  %s356_s16 = sshll.u32 %s257_s15, 4  ;;  %s357_s16 = int_to_ptr.vmem [resolvable:$true] %s356_s16 }
  0x32   : > { %v337_v56 = vunpack.c.0.s8 %v336_v55  ;;  %s358_s26 = sshll.u32 %s354_s14, 4  ;;  %s343_s6 = scalar_lea.sflag [#allocation4], %s786_s12  ;;  %s359_s26 = int_to_ptr.hbm [resolvable:$true] %s358_s26 }
  0x33   : > { %s602_s29 = sshra.s32 %s359_s26, 4  ;;  %s608_s17 = scalar_lea.hbm %s855_s5, 16  ;;  %s603_s29 = int_to_ptr.hbm [resolvable:$true] %s602_s29 }
  0x34   : > { %s604_s22 = scalar_lea.hbm %s603_s29, 8  ;;  %p609_p9 = scmp.lt.s32.totalorder %s603_s29, %s855_s5 }
  0x35   : > { %v261_v1 = vld.sshfl [vmem:[#allocation1] sm:$0xff pattern:$0x75316420]  ;;  %v262_v2 = vld.sshfl [vmem:[#allocation1 + $0x8] sm:$0xff pattern:$0x75316420]  ;;  %p605_p1 = scmp.ne.s32.totalorder %s603_s29, %s604_s22  ;;  %p610_p10 = scmp.lt.s32.totalorder %s608_s17, %s604_s22 }
  0x36   : > { %v266_v3 = vsel %vm265_vm0, %v261_v1, 0.0  ;;  %v267_v4 = vsel %vm265_vm0, %v262_v2, 0.0 }
  0x37   : > { %v268_v5 = vadd.f32 %v267_v4, %v266_v3  ;;  %p606_p4 = pnand %p605_p1, %p759_p3  ;;  %p611_p2 = por %p610_p10, %p609_p9 }
  0x39   : > { %269 = vadd.xlane.f32.xlu0 %v268_v5  ;;  %p607_p8 = pneg %p606_p4 }
  0x3b   : > { %p612_p11 = pnand %p611_p2, %p607_p8 }
  0xac   : > { %v270_v7 = vpop.xlane.xlu0 %269 }
  0xad   : > { %v271_v8 = vmul.f32 0.00390625, %v270_v7 }
  0xaf   : > { %v273_v9 = vmul.f32 %v272_v6, %v271_v8 }
  0xb1   : > { %v275_v10 = vsel %vm274_vm1, %v273_v9, 0.0 }
  0xb2   : > { %v276_v11 = vrot.slane %v275_v10, 4 }
  0xb4   : > { %v277_v12 = vadd.f32 %v276_v11, %v275_v10 }
  0xb6   : > { %v278_v13 = vrot.slane %v277_v12, 2 }
  0xb8   : > { %v279_v14 = vadd.f32 %v278_v13, %v277_v12 }
  0xba   : > { %v280_v15 = vrot.slane %v279_v14, 1 }
  0xbc   : > { %v281_v17 = vadd.f32 %v280_v15, %v279_v14 }
  0xbe   : > { %v283_v18 = vadd.f32 %v282_v16, %v281_v17 }
  0xc0   : > { %v450_v19 = vmul.f32 -1.442695, %v283_v18 }
  0xc2   : > { %520 = vpow2.f32 %v450_v19 }
  0xc8   : > { %v521_v20 = vpop.eup %520 }
  0xc9   : > { %v287_v21 = vadd.f32 1.0, %v521_v20 }
  0xcb   : > { %522 = vrcp.f32 %v287_v21  ;;  %v299_v25 = vand.u32 2147483648, %v287_v21  ;;  %v297_v27 = vand.u32 2147483647, %v287_v21  ;;  %vm293_vm3 = vweird.f32 %v287_v21 }
  0xcd   : > { %v300_v29 = vor.u32 1.1754944e-38, %v299_v25  ;;  %vm298_vm5 = vcmp.eq.f32.partialorder %v297_v27, 8.507059e+37 }
  0xd1   : > { %v523_v22 = vpop.eup %522 }
  0xd2   : > { %v289_v23 = vmul.f32 %v523_v22, %v287_v21  ;;  %vm294_vm2 = vweird.f32 %v523_v22 }
  0xd3   : > { %vm295_vm4 = vmor %vm293_vm3, %vm294_vm2 }
  0xd4   : > { %v290_v24 = vsub.f32 1.0, %v289_v23 }
  0xd6   : > { %v291_v26 = vmul.f32 %v523_v22, %v290_v24 }
  0xd8   : > { %v292_v28 = vadd.f32 %v523_v22, %v291_v26 }
  0xda   : > { %v296_v30 = vsel %vm295_vm4, %v523_v22, %v292_v28 }
  0xdb   : > { %v301_v31 = vsel %vm298_vm5, %v300_v29, %v296_v30 }
  0xdc   : > { %v303_v32 = vmul.f32 %v301_v31, %v283_v18 }
  0xde   : > { %v305_v34 = vperm.slane %v303_v32, 0 }
  0xe0   : > { %v306_v35 = vmul.f32 %v305_v34, %v304_v33 }
  0xe2   : > { %v307_v36 = vsel %vm274_vm1, %v306_v35, 0.0 }
  0xe3   : > { %308 = vadd.xlane.f32.xlu0 %v307_v36 }
 0x156   : > { %v309_v39 = vpop.xlane.xlu0 %308 }
 0x157   : > { %v311_v40 = vadd.f32 %v310_v38, %v309_v39 }
 0x159   : > { %v451_v41 = vmul.f32 -1.442695, %v311_v40 }
 0x15b   : > { %524 = vpow2.f32 %v451_v41 }
 0x161   : > { %v525_v42 = vpop.eup %524 }
 0x162   : > { %v315_v43 = vadd.f32 1.0, %v525_v42 }
 0x164   : > { %526 = vrcp.f32 %v315_v43  ;;  %v327_v47 = vand.u32 2147483648, %v315_v43  ;;  %v325_v49 = vand.u32 2147483647, %v315_v43  ;;  %vm321_vm7 = vweird.f32 %v315_v43 }
 0x166   : > { %v328_v51 = vor.u32 1.1754944e-38, %v327_v47  ;;  %vm326_vm9 = vcmp.eq.f32.partialorder %v325_v49, 8.507059e+37 }
 0x16a   : > { %v527_v44 = vpop.eup %526 }
 0x16b   : > { %v317_v45 = vmul.f32 %v527_v44, %v315_v43  ;;  %vm322_vm6 = vweird.f32 %v527_v44 }
 0x16c   : > { %vm323_vm8 = vmor %vm321_vm7, %vm322_vm6 }
 0x16d   : > { %v318_v46 = vsub.f32 1.0, %v317_v45 }
 0x16f   : > { %v319_v48 = vmul.f32 %v527_v44, %v318_v46 }
 0x171   : > { %v320_v50 = vadd.f32 %v527_v44, %v319_v48 }
 0x173   : > { %v324_v52 = vsel %vm323_vm8, %v527_v44, %v320_v50 }
 0x174   : > { %v329_v53 = vsel %vm326_vm9, %v328_v51, %v324_v52 }
 0x175   : > { %333 = vperm.xlu1 %518, %v329_v53  }
 0x1e7   : > { %v334_v57 = vpop.permute.xlu1 %333 }
 0x1e8   : > { %v338_v58 = vperm.slane %v334_v57, %v337_v56 }
 0x1ea   : > { %v340_v59 = vmul.f32 %v338_v58, %v800_v0 }
 0x1ec   : > { %341 = vst [vmem:[%s257_s15] sm:$0xff] %v340_v59 }
 0x1ed   : > { %615 = shalt.err (!%p612_p11)
}
 0x1ee   : > { %465 = dma.vmem_to_hbm [thread:$0]  (%p759_p3), %s357_s16, 128, %s359_s26, %s343_s6  }
 0x1ef PF: > { %s370_s12 = sand.u32 1, %s646_s18   ;;  %p861_p12 = scmp.ge.s32.totalorder %s658_s21, 2 }
 0x1f0   : > { %s371_s30 = scalar_lea.sflag [#allocation4], %s370_s12 }
 0x1f1   : > { %p476_p13 = pnand %p861_p12, %p728_p6 }
 0x1f3   : > { %p477_p0 = pneg %p476_p13 }
 0x1f5   : > { %641 = dma.done.wait (%p477_p0), %s371_s30, 128  }
 0x1f6   : > { %643 = vsyncadd (%p477_p0), %s371_s30, 4294967168  ;;  %p19_p5 = scmp.ge.s32.totalorder %s746_s7, 4   ;;  %s862_s18 = smov %s650_s19 }
 0x1f7   : > { %s863_s19 = smov %s654_s20  ;;  %s864_s20 = smov %s755_s10 }
 0x1f8   : > { %s865_s21 = smov %s746_s7  ;;  %21 = sbr.rel (!%p19_p5) target bundleno = 6 (0x6), region = 89 }
 0x1fd   :  { %377 = vsyncpa [#allocation3], 1 }
 0x1fe   :  { %379 = vsyncpa [#allocation3 + $0x1], 1 }
 0x1ff   :  { %380 = vsyncpa [#allocation6], 1 }
 0x200   :  { %381 = vsyncpa [#allocation4], 1 }
 0x201   :  { %383 = vsyncpa [#allocation4 + $0x1], 1 }

</bundles_post_ra>
